<compile_context>
chip_gen: v5e
topology: v5e:2x2
jax: 0.10.0
libtpu: 0.0.40
codegen_flags: <defaults>
</compile_context>

<pallas_src>
import jax
import jax.numpy as jnp
from jax.experimental import pallas as pl
from jax.experimental.pallas import tpu as pltpu


def learnable_margins_kernel(m_ref, o_ref):
    # m_ref, o_ref: (2,) float32 SMEM refs. Pure scalar reads/writes.
    m1 = m_ref[0]
    m2 = m_ref[1]
    # torch.clamp(m1, min=0)
    o_ref[0] = jnp.maximum(m1, jnp.float32(0.0))
    # torch.clamp(m2, min=m1 + 0.1) — lower bound uses the *raw* m1.
    o_ref[1] = jnp.maximum(m2, m1 + jnp.float32(0.1))


def learnable_margins(m1, m2):
    """
    m1, m2: scalar float32 parameters (shape ()).
    Returns (clamp(m1, min=0), clamp(m2, min=m1 + 0.1)) as scalar arrays,
    matching the PyTorch module's forward.
    """
    m = jnp.stack([jnp.asarray(m1, jnp.float32),
                   jnp.asarray(m2, jnp.float32)])          # (2,) f32

    smem_spec = pl.BlockSpec(memory_space=pltpu.MemorySpace.SMEM)

    out = pl.pallas_call(
        learnable_margins_kernel,
        out_shape=jax.ShapeDtypeStruct((2,), jnp.float32),
        in_specs=[smem_spec],
        out_specs=smem_spec,
    )(m)

    return out[0], out[1]


if __name__ == "__main__":
    key = jax.random.PRNGKey(0)
    k1, k2 = jax.random.split(key)

    # Parameters initialized like the module (0.6, 1.6) plus a small random
    # perturbation so the kernel is exercised with non-trivial values.
    m1 = jnp.float32(0.6) + 0.05 * jax.random.normal(k1, (), dtype=jnp.float32)
    m2 = jnp.float32(1.6) + 0.05 * jax.random.normal(k2, (), dtype=jnp.float32)

    o1, o2 = learnable_margins(m1, m2)
    o1, o2 = jax.block_until_ready((o1, o2))

    # Reference (same semantics as torch.clamp with a `min=` bound only).
    ref1 = jnp.maximum(m1, 0.0)
    ref2 = jnp.maximum(m2, m1 + 0.1)
    assert o1.shape == () and o2.shape == ()
    assert jnp.allclose(o1, ref1, atol=1e-6, rtol=1e-6)
    assert jnp.allclose(o2, ref2, atol=1e-6, rtol=1e-6)

    # Exercise both clamp branches explicitly (negative m1, m2 below m1 + 0.1).
    a1, a2 = learnable_margins(jnp.float32(-0.3), jnp.float32(-0.5))
    a1, a2 = jax.block_until_ready((a1, a2))
    assert jnp.allclose(a1, 0.0, atol=1e-6)
    assert jnp.allclose(a2, jnp.float32(-0.3) + 0.1, atol=1e-6)

    print("KERNEL_OK")
</pallas_src>

<mosaic_0001>
module attributes {stable_mosaic.version = 11 : i64} {
  func.func @learnable_margins_kernel(%arg0: memref<2xf32, #tpu.memory_space<smem>>, %arg1: memref<2xf32, #tpu.memory_space<smem>>) attributes {dimension_semantics = [], scalar_prefetch = 0 : i64, scratch_operands = 0 : i64, tpu.core_type = #tpu.core_type<tc>} {
    %c0 = arith.constant 0 : index
    %0 = memref.load %arg0[%c0] : memref<2xf32, #tpu.memory_space<smem>>
    %c1 = arith.constant 1 : index
    %1 = memref.load %arg0[%c1] : memref<2xf32, #tpu.memory_space<smem>>
    %cst = arith.constant 0.000000e+00 : f32
    %2 = arith.maximumf %0, %cst : f32
    %c0_0 = arith.constant 0 : index
    %3 = memref.load %arg1[%c0_0] : memref<2xf32, #tpu.memory_space<smem>>
    memref.store %2, %arg1[%c0_0] : memref<2xf32, #tpu.memory_space<smem>>
    %cst_1 = arith.constant 1.000000e-01 : f32
    %4 = arith.addf %0, %cst_1 : f32
    %5 = arith.maximumf %1, %4 : f32
    %c1_2 = arith.constant 1 : index
    %6 = memref.load %arg1[%c1_2] : memref<2xf32, #tpu.memory_space<smem>>
    memref.store %5, %arg1[%c1_2] : memref<2xf32, #tpu.memory_space<smem>>
    return
  }
}

</mosaic_0001>

<bundles_post_ra>
// kernel: tpu_custom_call.1
= control target key start
LH: loop header
LB: loop body
LE: loop exit
PB: predicated region body
PF: predicated region fallthrough
CT: control target
= control target key end

     0   :  { %6 = vsyncpa [#allocation3], 0  ;;  %s98_s0 = inlined_call_operand.hbm [shape: f32[2], index: 0, kind: input, shape index: {}]   ;;  %s99_s1 = inlined_call_operand.hbm [shape: f32[2], index: 1, kind: output, shape index: {}]  }
   0x1   :  { %7 = vsyncpa [#allocation4], 0  ;;  %s13_s8 = sshll.u32 %s98_s0, 4  ;;  %s79_s9 = smov [#allocation2]   ;;  %s14_s8 = int_to_ptr.hbm [resolvable:$true] %s13_s8 }
   0x2   :  { %16 = dma.hbm_to_smem %s14_s8, 16, %s79_s9, [#allocation3]  }
   0x3   :  { %75 = dma.done.wait [#allocation3], 16  }
   0x4   :  { %76 = vsyncadd [#allocation3], 4294967280 }
   0x5   :  { %21 = sfence }
   0x6   :  { %s22_s10 = sld [smem:[#allocation2]]  ;;  %s36_s14 = sshll.u32 %s99_s1, 4  ;;  %s37_s14 = int_to_ptr.hbm [resolvable:$true] %s36_s14 }
   0x7   :  { %s47_s11 = sld [smem:[#allocation2 + $0x1]]  ;;  %s80_s15 = smov 0.0  }
   0x8   :  { %s81_s0 = smov [#allocation5]  }
   0xc   :  { %s24_s16 = smax.f32 %s80_s15, %s22_s10  ;;  %s27_s17 = sadd.f32 0.1, %s22_s10 }
   0xd   :  { %26 = sst [smem:[#allocation5]] %s24_s16 }
   0xe   :  { %s28_s18 = smax.f32 %s47_s11, %s27_s17 }
   0xf   :  { %30 = sst [smem:[#allocation5 + $0x1]] %s28_s18 }
  0x10   :  { %39 = dma.smem_to_hbm %s81_s0, 16, %s37_s14, [#allocation4]  }
  0x11   :  { %77 = dma.done.wait [#allocation4], 16  }
  0x12   :  { %78 = vsyncadd [#allocation4], 4294967280 }
  0x13   :  { %44 = sfence }
  0x14   :  { %45 = vsyncpa [#allocation3], 1 }
  0x15   :  { %46 = vsyncpa [#allocation4], 1 }

</bundles_post_ra>
